<compile_context>
chip_gen: v7x
topology: tpu7x:2x2x1
jax: 0.10.0
libtpu: 0.0.40
codegen_flags: <defaults>
</compile_context>

<pallas_src>
import functools
from collections import namedtuple

import jax
import jax.numpy as jnp
from jax.experimental import pallas as pl
from jax.experimental.pallas import tpu as pltpu

LossOutput = namedtuple("LossOutput",
                        ["total_loss", "classification_loss", "regression_loss"])

_LANES = 128


def _head_loss_kernel(pred_t_ref, tgt_cls_ref, pos_ref, tgt_box_ref,
                      out_ref, ce_acc_ref, *,
                      n_rows, n_box_elems, has_pos, mask_rows):
    pid = pl.program_id(0)
    n_blocks = pl.num_programs(0)
    c, tn = pred_t_ref.shape

    @pl.when(pid == 0)
    def _init():
        ce_acc_ref[...] = jnp.zeros_like(ce_acc_ref)

    # ---- cross entropy on a lane-dense (C, tn) tile: ROIs map to lanes ----
    logits = pred_t_ref[...].astype(jnp.float32)                      # (C, TN)
    m = jnp.max(logits, axis=0, keepdims=True)                        # (1, TN)
    lse = jnp.log(jnp.sum(jnp.exp(logits - m), axis=0, keepdims=True)) + m

    # gather logit at target class via a single select + sublane reduce
    cls_idx = jax.lax.broadcasted_iota(jnp.int32, (c, tn), 0)         # (C, TN)
    tgt = tgt_cls_ref[...]                                            # (1, TN) int32
    tgt_logit = jnp.sum(jnp.where(cls_idx == tgt, logits, 0.0),
                        axis=0, keepdims=True)                        # (1, TN)

    per_row = lse - tgt_logit                                         # (1, TN)

    if mask_rows:
        # Only the (partial) last block needs the ROI mask.
        @pl.when(pid < n_blocks - 1)
        def _acc_full():
            ce_acc_ref[...] += per_row

        @pl.when(pid == n_blocks - 1)
        def _acc_masked():
            lane = jax.lax.broadcasted_iota(jnp.int32, (1, tn), 1) + pid * tn
            ce_acc_ref[...] += jnp.where(lane < n_rows, per_row, 0.0)
    else:
        ce_acc_ref[...] += per_row

    # ---- finalize: reduce CE, smooth-L1, pack [cls, reg, total] lane-dense ----
    @pl.when(pid == n_blocks - 1)
    def _finalize():
        cls_mean = (jnp.sum(ce_acc_ref[...], axis=(0, 1), keepdims=True)
                    * jnp.float32(1.0 / n_rows))                      # (1, 1)

        if has_pos:
            d = (pos_ref[...].astype(jnp.float32)
                 - tgt_box_ref[...].astype(jnp.float32))              # lane-dense
            ad = jnp.abs(d)
            sl1 = jnp.where(ad < 1.0, 0.5 * d * d, ad - 0.5)
            # zero padding contributes 0; multiply by reciprocal of true count
            reg_mean = (jnp.sum(sl1, axis=(0, 1), keepdims=True)
                        * jnp.float32(1.0 / n_box_elems))             # (1, 1)
        else:
            reg_mean = jnp.zeros((1, 1), jnp.float32)

        tot = cls_mean + reg_mean

        lane = jax.lax.broadcasted_iota(jnp.int32, (1, _LANES), 1)
        cls_b = jnp.broadcast_to(cls_mean, (1, _LANES))
        reg_b = jnp.broadcast_to(reg_mean, (1, _LANES))
        tot_b = jnp.broadcast_to(tot, (1, _LANES))
        out_ref[...] = jnp.where(lane == 0, cls_b,
                                 jnp.where(lane == 1, reg_b,
                                           jnp.where(lane == 2, tot_b, 0.0)))


def _pack_lane_dense(x):
    """Flatten and zero-pad to a multiple of 128, reshape to (rows, 128)."""
    flat = x.reshape(-1)
    n = flat.shape[0]
    padded = max(_LANES, ((n + _LANES - 1) // _LANES) * _LANES)
    if padded != n:
        flat = jnp.pad(flat, (0, padded - n))
    return flat.reshape(-1, _LANES)


def _choose_col_tile(n, c, logit_bytes, box_bytes,
                     vmem_budget=8 << 20, max_tile=None):
    """Pick the ROI tile (lanes of the transposed logits) from a VMEM budget.

    For realistic head-loss shapes this returns n, collapsing the grid to a
    single step on every TPU generation (v5e/v6e/v7x)."""
    per_col = 2 * (c * logit_bytes + 4)          # double-buffered logits + targets
    avail = max(vmem_budget - 2 * box_bytes, 1 << 20)
    budget_cols = max(_LANES, (avail // per_col) // _LANES * _LANES)
    if max_tile is not None:
        budget_cols = max(_LANES, (min(budget_cols, max_tile) // _LANES) * _LANES)
    return n if n <= budget_cols else budget_cols


def head_loss(positive_boxes, pred_cls, target_boxes, target_cls, *,
              _max_col_tile=None):
    """positive_boxes/target_boxes: (M, B); pred_cls: (N, C);
    target_cls: (N,) int class indices. Returns LossOutput of scalars.

    `_max_col_tile` is a test-only override that forces a smaller ROI tile so
    the multi-block / masked-last-block path can be exercised."""
    n, c = pred_cls.shape
    # Wrapper-side transpose: cheap layout plumbing so ROIs map to lanes.
    pred_t = pred_cls.T                                   # (C, N), native dtype
    tgt_cls_2d = target_cls.astype(jnp.int32).reshape(1, n)

    # Python-level (static shape) check mirrors `if len(positive_boxes) == 0`.
    has_pos = positive_boxes.shape[0] > 0
    n_box_elems = (positive_boxes.shape[0] * positive_boxes.shape[1]
                   if has_pos else 1)
    if not has_pos:
        # Dummy lane-dense blocks keep kernel shapes valid; contents unused.
        positive_boxes = jnp.zeros((1, _LANES), jnp.float32)
        target_boxes = jnp.zeros((1, _LANES), jnp.float32)

    # Lane-dense packing of the box tensors (native dtype, cast in-kernel).
    pos_ld = _pack_lane_dense(positive_boxes)
    tgt_ld = _pack_lane_dense(target_boxes)
    box_bytes = (pos_ld.size + tgt_ld.size) * pos_ld.dtype.itemsize

    tn = _choose_col_tile(n, c, pred_cls.dtype.itemsize, box_bytes,
                          max_tile=_max_col_tile)
    grid = (pl.cdiv(n, tn),)
    mask_rows = (n % tn) != 0

    kernel = functools.partial(_head_loss_kernel,
                               n_rows=n, n_box_elems=n_box_elems,
                               has_pos=has_pos, mask_rows=mask_rows)

    out = pl.pallas_call(
        kernel,
        out_shape=jax.ShapeDtypeStruct((1, _LANES), jnp.float32),
        grid_spec=pltpu.PrefetchScalarGridSpec(
            num_scalar_prefetch=0,
            grid=grid,
            in_specs=[
                pl.BlockSpec((c, tn), lambda i: (0, i)),       # logits (C, tn)
                pl.BlockSpec((1, tn), lambda i: (0, i)),       # targets (1, tn)
                pl.BlockSpec(pos_ld.shape, lambda i: (0, 0)),  # resident box slab
                pl.BlockSpec(tgt_ld.shape, lambda i: (0, 0)),  # resident box slab
            ],
            out_specs=pl.BlockSpec((1, _LANES), lambda i: (0, 0)),
            scratch_shapes=[pltpu.VMEM((1, tn), jnp.float32)],
        ),
        compiler_params=pltpu.CompilerParams(
            dimension_semantics=("arbitrary",)),
    )(pred_t, tgt_cls_2d, pos_ld, tgt_ld)

    return LossOutput(total_loss=out[0, 2],
                      classification_loss=out[0, 0],
                      regression_loss=out[0, 1])


def _ref_losses(positive_boxes, pred_cls, target_boxes, target_cls):
    logz = pred_cls.astype(jnp.float32)
    logz = logz - jax.nn.logsumexp(logz, axis=-1, keepdims=True)
    ce = -jnp.mean(jnp.take_along_axis(logz, target_cls[:, None], axis=-1))
    if positive_boxes.shape[0] == 0:
        reg = jnp.float32(0.0)
    else:
        d = positive_boxes.astype(jnp.float32) - target_boxes.astype(jnp.float32)
        reg = jnp.mean(jnp.where(jnp.abs(d) < 1.0, 0.5 * d * d, jnp.abs(d) - 0.5))
    return ce, reg


if __name__ == "__main__":
    key = jax.random.PRNGKey(0)
    k1, k2, k3, k4, k5, k6, k7, k8 = jax.random.split(key, 8)

    # --- small case: single-block path (grid collapses to 1) ---
    N, C = 8, 16     # rois x num_classes
    M, B = 8, 5      # positive rois x box params (cx, cy, w, h, theta)
    pred_cls = jax.random.normal(k1, (N, C), jnp.float32)
    target_cls = jax.random.randint(k2, (N,), 0, C, jnp.int32)
    positive_boxes = jax.random.normal(k3, (M, B), jnp.float32)
    target_boxes = positive_boxes + 0.5 * jax.random.normal(k4, (M, B), jnp.float32)

    out = head_loss(positive_boxes, pred_cls, target_boxes, target_cls)
    jax.block_until_ready(out.total_loss)

    ce_ref, reg_ref = _ref_losses(positive_boxes, pred_cls, target_boxes, target_cls)
    assert jnp.allclose(out.classification_loss, ce_ref, atol=1e-5)
    assert jnp.allclose(out.regression_loss, reg_ref, atol=1e-5)
    assert jnp.allclose(out.total_loss, ce_ref + reg_ref, atol=1e-5)

    # --- forced multi-block case: exercises masked partial last block ---
    N2, M2 = 300, 20
    pred_cls2 = jax.random.normal(k5, (N2, C), jnp.float32)
    target_cls2 = jax.random.randint(k6, (N2,), 0, C, jnp.int32)
    pos2 = jax.random.normal(k7, (M2, B), jnp.float32)
    tgt2 = pos2 + 0.5 * jax.random.normal(k8, (M2, B), jnp.float32)

    out2 = head_loss(pos2, pred_cls2, tgt2, target_cls2, _max_col_tile=128)
    jax.block_until_ready(out2.total_loss)

    ce_ref2, reg_ref2 = _ref_losses(pos2, pred_cls2, tgt2, target_cls2)
    assert jnp.allclose(out2.classification_loss, ce_ref2, atol=1e-5)
    assert jnp.allclose(out2.regression_loss, reg_ref2, atol=1e-5)
    assert jnp.allclose(out2.total_loss, ce_ref2 + reg_ref2, atol=1e-5)

    # --- no positive boxes: regression loss must be exactly 0 ---
    empty_boxes = jnp.zeros((0, B), jnp.float32)
    out3 = head_loss(empty_boxes, pred_cls, empty_boxes, target_cls)
    jax.block_until_ready(out3.total_loss)
    assert jnp.allclose(out3.regression_loss, 0.0)
    assert jnp.allclose(out3.classification_loss, ce_ref, atol=1e-5)
    assert jnp.allclose(out3.total_loss, ce_ref, atol=1e-5)

    # --- bf16 inputs: native-dtype DMA, f32 math in-kernel ---
    pred_bf = pred_cls.astype(jnp.bfloat16)
    pos_bf = positive_boxes.astype(jnp.bfloat16)
    tgt_bf = target_boxes.astype(jnp.bfloat16)
    out4 = head_loss(pos_bf, pred_bf, tgt_bf, target_cls)
    jax.block_until_ready(out4.total_loss)
    ce_ref4, reg_ref4 = _ref_losses(pos_bf, pred_bf, tgt_bf, target_cls)
    assert jnp.allclose(out4.classification_loss, ce_ref4, atol=1e-3)
    assert jnp.allclose(out4.regression_loss, reg_ref4, atol=1e-3)
    assert jnp.allclose(out4.total_loss, ce_ref4 + reg_ref4, atol=1e-3)

    print("KERNEL_OK")
</pallas_src>

<mosaic_0001>
module attributes {stable_mosaic.version = 11 : i64} {
  func.func @_head_loss_kernel(%arg0: i32, %arg1: memref<16x8xf32, #tpu.memory_space<vmem>>, %arg2: memref<1x8xi32, #tpu.memory_space<vmem>>, %arg3: memref<1x128xf32, #tpu.memory_space<vmem>>, %arg4: memref<1x128xf32, #tpu.memory_space<vmem>>, %arg5: memref<1x128xf32, #tpu.memory_space<vmem>>, %arg6: memref<1x8xf32, #tpu.memory_space<vmem>>) attributes {dimension_semantics = [#tpu.dimension_semantics<arbitrary>], iteration_bounds = array<i64: 1>, scalar_prefetch = 0 : i64, scratch_operands = 1 : i64, tpu.core_type = #tpu.core_type<tc>, window_params = [{transform_indices = @transform_0, window_bounds = array<i64: 16, 8>}, {transform_indices = @transform_1, window_bounds = array<i64: 1, 8>}, {pipeline_mode = #tpu.pipeline_mode<synchronous>, transform_indices = @transform_2, window_bounds = array<i64: 1, 128>}, {pipeline_mode = #tpu.pipeline_mode<synchronous>, transform_indices = @transform_3, window_bounds = array<i64: 1, 128>}, {pipeline_mode = #tpu.pipeline_mode<synchronous>, transform_indices = @transform_4, window_bounds = array<i64: 1, 128>}]} {
    %c0_i32 = arith.constant 0 : i32
    %0 = arith.cmpi eq, %arg0, %c0_i32 : i32
    %1 = arith.extui %0 : i1 to i32
    %c0_i32_0 = arith.constant 0 : i32
    %2 = arith.cmpi ne, %1, %c0_i32_0 : i32
    scf.if %2 {
      %cst_13 = arith.constant 0.000000e+00 : f32
      %28 = vector.broadcast %cst_13 : f32 to vector<1x8xf32>
      %c0_14 = arith.constant 0 : index
      %c0_15 = arith.constant 0 : index
      %29 = vector.load %arg6[%c0_14, %c0_15] : memref<1x8xf32, #tpu.memory_space<vmem>>, vector<1x8xf32>
      tpu.vector_store %arg6[%c0_14, %c0_15], %28 {strides = array<i32>} : memref<1x8xf32, #tpu.memory_space<vmem>>, vector<1x8xf32>,
    } else {
    }
    %c0 = arith.constant 0 : index
    %c0_1 = arith.constant 0 : index
    %3 = vector.load %arg1[%c0, %c0_1] : memref<16x8xf32, #tpu.memory_space<vmem>>, vector<16x8xf32>
    %cst = arith.constant dense<0xFF800000> : vector<8xf32>
    %4 = vector.multi_reduction <maximumf>, %3, %cst [0] : vector<16x8xf32> to vector<8xf32>
    %5 = vector.shape_cast %4 : vector<8xf32> to vector<1x8xf32>
    %6 = vector.broadcast %5 : vector<1x8xf32> to vector<16x8xf32>
    %7 = arith.subf %3, %6 : vector<16x8xf32>
    %8 = math.exp %7 : vector<16x8xf32>
    %cst_2 = arith.constant dense<0.000000e+00> : vector<8xf32>
    %9 = vector.multi_reduction <add>, %8, %cst_2 [0] : vector<16x8xf32> to vector<8xf32>
    %10 = vector.shape_cast %9 : vector<8xf32> to vector<1x8xf32>
    %11 = math.log %10 : vector<1x8xf32>
    %12 = arith.addf %11, %5 : vector<1x8xf32>
    %13 = tpu.iota {dimensions = array<i32: 0>} : vector<16x8xi32>
    %c0_3 = arith.constant 0 : index
    %c0_4 = arith.constant 0 : index
    %14 = vector.load %arg2[%c0_3, %c0_4] : memref<1x8xi32, #tpu.memory_space<vmem>>, vector<1x8xi32>
    %15 = vector.broadcast %14 : vector<1x8xi32> to vector<16x8xi32>
    %16 = arith.cmpi eq, %13, %15 : vector<16x8xi32>
    %cst_5 = arith.constant 0.000000e+00 : f32
    %17 = vector.broadcast %cst_5 : f32 to vector<16x8xf32>
    %18 = arith.select %16, %3, %17 : vector<16x8xi1>, vector<16x8xf32>
    %cst_6 = arith.constant dense<0.000000e+00> : vector<8xf32>
    %19 = vector.multi_reduction <add>, %18, %cst_6 [0] : vector<16x8xf32> to vector<8xf32>
    %20 = vector.shape_cast %19 : vector<8xf32> to vector<1x8xf32>
    %21 = arith.subf %12, %20 : vector<1x8xf32>
    %c0_7 = arith.constant 0 : index
    %c0_8 = arith.constant 0 : index
    %22 = vector.load %arg6[%c0_7, %c0_8] : memref<1x8xf32, #tpu.memory_space<vmem>>, vector<1x8xf32>
    %23 = arith.addf %22, %21 : vector<1x8xf32>
    %c0_9 = arith.constant 0 : index
    %c0_10 = arith.constant 0 : index
    %24 = vector.load %arg6[%c0_9, %c0_10] : memref<1x8xf32, #tpu.memory_space<vmem>>, vector<1x8xf32>
    tpu.vector_store %arg6[%c0_9, %c0_10], %23 {strides = array<i32>} : memref<1x8xf32, #tpu.memory_space<vmem>>, vector<1x8xf32>,
    %c0_i32_11 = arith.constant 0 : i32
    %25 = arith.cmpi eq, %arg0, %c0_i32_11 : i32
    %26 = arith.extui %25 : i1 to i32
    %c0_i32_12 = arith.constant 0 : i32
    %27 = arith.cmpi ne, %26, %c0_i32_12 : i32
    scf.if %27 {
      %c0_13 = arith.constant 0 : index
      %c0_14 = arith.constant 0 : index
      %28 = vector.load %arg6[%c0_13, %c0_14] : memref<1x8xf32, #tpu.memory_space<vmem>>, vector<1x8xf32>
      %29 = vector.shape_cast %28 : vector<1x8xf32> to vector<1x1x8xf32>
      %cst_15 = arith.constant dense<0.000000e+00> : vector<1xf32>
      %30 = vector.multi_reduction <add>, %29, %cst_15 [1, 2] : vector<1x1x8xf32> to vector<1xf32>
      %31 = vector.shape_cast %30 : vector<1xf32> to vector<1x1x1xf32>
      %32 = vector.extract %31[0, 0, 0] : f32 from vector<1x1x1xf32>
      %33 = vector.broadcast %32 : f32 to vector<1x1xf32>
      %cst_16 = arith.constant 1.250000e-01 : f32
      %34 = vector.broadcast %cst_16 : f32 to vector<1x1xf32>
      %35 = arith.mulf %33, %34 : vector<1x1xf32>
      %c0_17 = arith.constant 0 : index
      %c0_18 = arith.constant 0 : index
      %36 = vector.load %arg3[%c0_17, %c0_18] : memref<1x128xf32, #tpu.memory_space<vmem>>, vector<1x128xf32>
      %c0_19 = arith.constant 0 : index
      %c0_20 = arith.constant 0 : index
      %37 = vector.load %arg4[%c0_19, %c0_20] : memref<1x128xf32, #tpu.memory_space<vmem>>, vector<1x128xf32>
      %38 = arith.subf %36, %37 : vector<1x128xf32>
      %39 = math.absf %38 : vector<1x128xf32>
      %cst_21 = arith.constant 1.000000e+00 : f32
      %40 = vector.broadcast %cst_21 : f32 to vector<1x128xf32>
      %41 = arith.cmpf olt, %39, %40 : vector<1x128xf32>
      %cst_22 = arith.constant 5.000000e-01 : f32
      %42 = vector.broadcast %cst_22 : f32 to vector<1x128xf32>
      %43 = arith.mulf %42, %38 : vector<1x128xf32>
      %44 = arith.mulf %43, %38 : vector<1x128xf32>
      %cst_23 = arith.constant 5.000000e-01 : f32
      %45 = vector.broadcast %cst_23 : f32 to vector<1x128xf32>
      %46 = arith.subf %39, %45 : vector<1x128xf32>
      %47 = arith.select %41, %44, %46 : vector<1x128xi1>, vector<1x128xf32>
      %48 = vector.shape_cast %47 : vector<1x128xf32> to vector<1x1x128xf32>
      %cst_24 = arith.constant dense<0.000000e+00> : vector<1xf32>
      %49 = vector.multi_reduction <add>, %48, %cst_24 [1, 2] : vector<1x1x128xf32> to vector<1xf32>
      %50 = vector.shape_cast %49 : vector<1xf32> to vector<1x1x1xf32>
      %51 = vector.extract %50[0, 0, 0] : f32 from vector<1x1x1xf32>
      %52 = vector.broadcast %51 : f32 to vector<1x1xf32>
      %cst_25 = arith.constant 2.500000e-02 : f32
      %53 = vector.broadcast %cst_25 : f32 to vector<1x1xf32>
      %54 = arith.mulf %52, %53 : vector<1x1xf32>
      %55 = arith.addf %35, %54 : vector<1x1xf32>
      %56 = tpu.iota {dimensions = array<i32: 1>} : vector<1x128xi32>
      %57 = vector.shape_cast %35 : vector<1x1xf32> to vector<1x1xf32>
      %58 = vector.broadcast %57 : vector<1x1xf32> to vector<1x128xf32>
      %59 = vector.shape_cast %54 : vector<1x1xf32> to vector<1x1xf32>
      %60 = vector.broadcast %59 : vector<1x1xf32> to vector<1x128xf32>
      %61 = vector.shape_cast %55 : vector<1x1xf32> to vector<1x1xf32>
      %62 = vector.broadcast %61 : vector<1x1xf32> to vector<1x128xf32>
      %c0_i32_26 = arith.constant 0 : i32
      %63 = vector.broadcast %c0_i32_26 : i32 to vector<1x128xi32>
      %64 = arith.cmpi eq, %56, %63 : vector<1x128xi32>
      %c1_i32 = arith.constant 1 : i32
      %65 = vector.broadcast %c1_i32 : i32 to vector<1x128xi32>
      %66 = arith.cmpi eq, %56, %65 : vector<1x128xi32>
      %c2_i32 = arith.constant 2 : i32
      %67 = vector.broadcast %c2_i32 : i32 to vector<1x128xi32>
      %68 = arith.cmpi eq, %56, %67 : vector<1x128xi32>
      %cst_27 = arith.constant 0.000000e+00 : f32
      %69 = vector.broadcast %cst_27 : f32 to vector<1x128xf32>
      %70 = arith.select %68, %62, %69 : vector<1x128xi1>, vector<1x128xf32>
      %71 = arith.select %66, %60, %70 : vector<1x128xi1>, vector<1x128xf32>
      %72 = arith.select %64, %58, %71 : vector<1x128xi1>, vector<1x128xf32>
      %c0_28 = arith.constant 0 : index
      %c0_29 = arith.constant 0 : index
      %73 = vector.load %arg5[%c0_28, %c0_29] : memref<1x128xf32, #tpu.memory_space<vmem>>, vector<1x128xf32>
      tpu.vector_store %arg5[%c0_28, %c0_29], %72 {strides = array<i32>} : memref<1x128xf32, #tpu.memory_space<vmem>>, vector<1x128xf32>,
    } else {
    }
    return
  }
  func.func @transform_0(%arg0: i32) -> (i32, i32) {
    %c0_i32 = arith.constant 0 : i32
    %c0_i32_0 = arith.constant 0 : i32
    return %c0_i32, %arg0 : i32, i32
  }
  func.func @transform_1(%arg0: i32) -> (i32, i32) {
    %c0_i32 = arith.constant 0 : i32
    %c0_i32_0 = arith.constant 0 : i32
    return %c0_i32, %arg0 : i32, i32
  }
  func.func @transform_2(%arg0: i32) -> (i32, i32) {
    %c0_i32 = arith.constant 0 : i32
    %c0_i32_0 = arith.constant 0 : i32
    %c0_i32_1 = arith.constant 0 : i32
    return %c0_i32, %c0_i32_0 : i32, i32
  }
  func.func @transform_3(%arg0: i32) -> (i32, i32) {
    %c0_i32 = arith.constant 0 : i32
    %c0_i32_0 = arith.constant 0 : i32
    %c0_i32_1 = arith.constant 0 : i32
    return %c0_i32, %c0_i32_0 : i32, i32
  }
  func.func @transform_4(%arg0: i32) -> (i32, i32) {
    %c0_i32 = arith.constant 0 : i32
    %c0_i32_0 = arith.constant 0 : i32
    %c0_i32_1 = arith.constant 0 : i32
    return %c0_i32, %c0_i32_0 : i32, i32
  }
}

</mosaic_0001>

<bundles_post_ra>
// kernel: tpu_custom_call.1
= control target key start
LH: loop header
LB: loop body
LE: loop exit
PB: predicated region body
PF: predicated region fallthrough
CT: control target
= control target key end

     0   :  { %vm22_vm0 = vcmask 57344   ;;  %vm26_vm1 = vcmask 64512   ;;  %v180_v2 = vmov 0.0   ;;  %s245_s0 = inlined_call_operand.vmem [shape: f32[16,8], index: 0, kind: input, shape index: {}]   ;;  %s246_s1 = inlined_call_operand.vmem [shape: s32[1,8], index: 1, kind: input, shape index: {}]   ;;  %s247_s2 = inlined_call_operand.vmem [shape: f32[1,128], index: 2, kind: input, shape index: {}]   ;;  %s248_s3 = inlined_call_operand.vmem [shape: f32[1,128], index: 3, kind: input, shape index: {}]   ;;  %s249_s4 = inlined_call_operand.hbm [shape: f32[1,128], index: 4, kind: output, shape index: {}]  }
   0x1   :  { %v24_v0 = vld [vmem:[%s245_s0] sm:$0xff]  ;;  %v25_v1 = vld [vmem:[%s245_s0 + $0x8] sm:$0xff]  ;;  %23 = vst.msk [vmem:[#allocation2] sm:$0x1] %vm22_vm0, %v180_v2 }
   0x2   :  { %v27_v3 = vsel %vm26_vm1, %v24_v0, -inf  ;;  %v28_v4 = vsel %vm26_vm1, %v25_v1, -inf }
   0x3   :  { %v29_v5 = vmax.f32 %v27_v3, %v28_v4 }
   0x4   :  { %9 = vsyncpa [#allocation4], 0  ;;  %v54_v11 = vlaneseq  ;;  %v142_v19 = vld [vmem:[%s246_s1] ss:$0 sm:$0xff]  ;;  %vm105_vm5 = vcmask 1040384   ;;  %s181_s23 = smov [#allocation3]  }
   0x5   :  { %v30_v6 = vrot.slane %v29_v5, 4  ;;  %v96_v44 = vld [vmem:[%s247_s2] sm:$0x1]  ;;  %s134_s24 = sshll.u32 %s181_s23, 4  ;;  %s135_s24 = int_to_ptr.vmem [resolvable:$true] %s134_s24 }
   0x6   :  { %v55_v15 = vshrl.u32 %v54_v11, 7  ;;  %v97_v45 = vld [vmem:[%s248_s3] sm:$0x1]  ;;  %s156_s25 = scalar_lea.vmem %s135_s24, 16  ;;  %s160_s26 = scalar_lea.vmem %s135_s24, 32 }
   0x7   :  { %v31_v7 = vmax.f32 %v29_v5, %v30_v6  ;;  %v98_v48 = vsub.f32 %v96_v44, %v97_v45  ;;  %p157_p0 = scmp.ne.s32.totalorder %s135_s24, %s156_s25  ;;  %p161_p1 = scmp.lt.s32.totalorder %s135_s24, %s135_s24 }
   0x8   :  { %v56_v18 = vadd.s32 8, %v55_v15  ;;  %vm62_vm2 = vcmp.eq.s32.totalorder %v55_v15, %v142_v19  ;;  %v76_v47 = vld [vmem:[#allocation2] sm:$0x1]  ;;  %p162_p2 = scmp.lt.s32.totalorder %s160_s26, %s156_s25 }
   0x9   :  { %v32_v8 = vrot.slane %v31_v7, 2  ;;  %v64_v20 = vsel %vm62_vm2, %v24_v0, 0.0  ;;  %v99_v51 = vand.u32 2147483647, %v98_v48  ;;  %v101_v52 = vmul.f32 0.5, %v98_v48 }
   0xa   :  { %vm63_vm3 = vcmp.eq.s32.totalorder %v56_v18, %v142_v19  ;;  %v66_v25 = vsel %vm26_vm1, %v64_v20, 0.0  ;;  %p163_p3 = por %p162_p2, %p161_p1 }
   0xb   :  { %v33_v9 = vmax.f32 %v31_v7, %v32_v8  ;;  %v65_v21 = vsel %vm63_vm3, %v25_v1, 0.0  ;;  %v102_v53 = vmul.f32 %v101_v52, %v98_v48  ;;  %v143_v54 = vadd.f32 -0.5, %v99_v51 }
   0xc   :  { %v67_v26 = vsel %vm26_vm1, %v65_v21, 0.0  ;;  %vm100_vm4 = vcmp.lt.f32.partialorder %v99_v51, 1.0  ;;  %p164_p4 = pnand %p163_p3, %p157_p0 }
   0xd   :  { %v34_v10 = vrot.slane %v33_v9, 1  ;;  %v68_v29 = vadd.f32 %v67_v26, %v66_v25  ;;  %v104_v56 = vsel %vm100_vm4, %v102_v53, %v143_v54 }
   0xe   :  { %v106_v58 = vsel %vm105_vm5, %v104_v56, 0.0 }
   0xf   :  { %v35_v12 = vmax.f32 %v33_v9, %v34_v10  ;;  %v69_v32 = vrot.slane %v68_v29, 4  ;;  %v120_v10 = vand.u32 127, %v54_v11 }
  0x11   :  { %v36_v13 = vsub.f32 %v24_v0, %v35_v12  ;;  %v37_v14 = vsub.f32 %v25_v1, %v35_v12  ;;  %v70_v35 = vadd.f32 %v69_v32, %v68_v29  ;;  %vm123_vm6 = vcmp.eq.s32.totalorder %v120_v10, 2 }
  0x12   :  { %vm122_vm7 = vcmp.eq.s32.totalorder %v120_v10, 1  ;;  %vm121_vm8 = vcmp.eq.s32.totalorder %v120_v10, 0 }
  0x13   :  { %v38_v16 = vmul.f32 1.442695, %v36_v13  ;;  %v40_v17 = vmul.f32 1.442695, %v37_v14  ;;  %v71_v38 = vrot.slane %v70_v35, 2 }
  0x15   :  { %150 = vpow2.f32 %v38_v16  ;;  %v72_v39 = vadd.f32 %v71_v38, %v70_v35 }
  0x16   :  { %152 = vpow2.f32 %v40_v17 }
  0x17   :  { %v73_v40 = vrot.slane %v72_v39, 1 }
  0x19   :  { %v74_v43 = vadd.f32 %v73_v40, %v72_v39 }
  0x1f   :  { %v151_v22 = vpop.eup %150 }
  0x20   :  { %v153_v23 = vpop.eup %152  ;;  %v42_v24 = vsel %vm26_vm1, %v151_v22, 0.0 }
  0x21   :  { %v43_v27 = vsel %vm26_vm1, %v153_v23, 0.0 }
  0x22   :  { %v44_v28 = vadd.f32 %v43_v27, %v42_v24 }
  0x24   :  { %v45_v30 = vrot.slane %v44_v28, 4 }
  0x26   :  { %v46_v31 = vadd.f32 %v45_v30, %v44_v28 }
  0x28   :  { %v47_v33 = vrot.slane %v46_v31, 2 }
  0x2a   :  { %v48_v34 = vadd.f32 %v47_v33, %v46_v31 }
  0x2c   :  { %v49_v36 = vrot.slane %v48_v34, 1 }
  0x2e   :  { %v50_v37 = vadd.f32 %v49_v36, %v48_v34 }
  0x30   :  { %154 = vlog2.f32 %v50_v37 }
  0x3a   :  { %v155_v41 = vpop.eup %154 }
  0x3b   :  { %v52_v42 = vmul.f32 0.6931472, %v155_v41 }
  0x3d   :  { %v53_v46 = vadd.f32 %v52_v42, %v35_v12 }
  0x3f   :  { %v75_v49 = vsub.f32 %v53_v46, %v74_v43 }
  0x41   :  { %v77_v50 = vadd.f32 %v76_v47, %v75_v49 }
  0x43   :  { %79 = vst.msk [vmem:[#allocation2] sm:$0x1] %vm22_vm0, %v77_v50 }
  0x4a   :  { %v83_v55 = vld [vmem:[#allocation2] sm:$0x1] }
  0x4b   :  { %v84_v57 = vsel %vm22_vm0, %v83_v55, 0.0 }
  0x4c   :  { %85 = vadd.xlane.f32.xlu0 %v84_v57 }
  0x50   :  { %107 = vadd.xlane.f32.xlu0 %v106_v58 }
  0xd9   :  { %v86_v59 = vpop.xlane.xlu0 %85 }
  0xda   :  { %v87_v60 = vrot.slane %v86_v59, 4 }
  0xdc   :  { %v88_v61 = vadd.f32 %v87_v60, %v86_v59 }
  0xdd   :  { %v108_v62 = vpop.xlane.xlu0 %107 }
  0xde   :  { %v89_v63 = vrot.slane %v88_v61, 2  ;;  %v109_v0 = vrot.slane %v108_v62, 4 }
  0xe0   :  { %v110_v1 = vadd.f32 %v109_v0, %v108_v62  ;;  %v90_v2 = vadd.f32 %v89_v63, %v88_v61 }
  0xe2   :  { %v111_v3 = vrot.slane %v110_v1, 2  ;;  %v91_v4 = vrot.slane %v90_v2, 1 }
  0xe4   :  { %v112_v5 = vadd.f32 %v111_v3, %v110_v1  ;;  %v92_v6 = vadd.f32 %v91_v4, %v90_v2 }
  0xe6   :  { %144 = vpush %v92_v6  ;;  %v113_v7 = vrot.slane %v112_v5, 1 }
  0xe8   :  { %v114_v8 = vadd.f32 %v113_v7, %v112_v5 }
  0xea   :  { %146 = vpush %v114_v8 }
 0x117   :  { %s145_s2 = spop %144 }
 0x118   :  { %v94_v9 = vstv %s145_s2 }
 0x119   :  { %v95_v13 = vmul.f32 0.125, %v94_v9 }
 0x11b   :  { %s147_s3 = spop %146 }
 0x11c   :  { %v116_v12 = vstv %s147_s3 }
 0x11d   :  { %v117_v14 = vmul.f32 0.025, %v116_v12 }
 0x11f   :  { %v118_v15 = vadd.f32 %v117_v14, %v95_v13 }
 0x121   :  { %v124_v16 = vsel %vm123_vm6, %v118_v15, 0.0 }
 0x122   :  { %v125_v17 = vsel %vm122_vm7, %v117_v14, %v124_v16 }
 0x123   :  { %v126_v18 = vsel %vm121_vm8, %v95_v13, %v125_v17 }
 0x124   :  { %127 = vst [vmem:[#allocation3] sm:$0x1] %v126_v18 }
 0x125   :  { %167 = shalt.err (!%p164_p4)
}
 0x126   :  { %s168_s29 = scalar_lea.hbm %s249_s4, 16 }
 0x127   :  { %p169_p5 = scmp.ne.s32.totalorder %s249_s4, %s168_s29  ;;  %p172_p6 = scmp.lt.u32.totalorder %s168_s29, %s249_s4 }
 0x129   :  { %p174_p7 = pnand %p172_p6, %p169_p5 }
 0x12b   :  { %177 = shalt.err (!%p174_p7)
}
 0x12c   :  { %137 = dma.vmem_to_hbm [thread:$0]  %s135_s24, 16, %s249_s4, [#allocation4]  }
 0x12d   :  { %178 = dma.done.wait [#allocation4], 16  }
 0x12e   :  { %179 = vsyncadd [#allocation4], 4294967280 }
 0x12f   :  { %141 = vsyncpa [#allocation4], 1 }

</bundles_post_ra>
